<compile_context>
chip_gen: v7x
topology: tpu7x:2x2x1
jax: 0.10.0
libtpu: 0.0.40
codegen_flags: <defaults>
</compile_context>

<pallas_src>
import jax
import jax.numpy as jnp
from jax import lax
from jax.experimental import pallas as pl
from jax.experimental.pallas import tpu as pltpu
import numpy as np

BN_EPS = 1e-5


def _round_up(x, m):
    return ((x + m - 1) // m) * m


def _spatial_tiling(s, kp, budget_bytes=6 * 1024 * 1024):
    """Pick the per-image spatial tile TS (lane axis) and the padded spatial extent.

    The dominant per-step VMEM buffer is the (Kp, TS) bf16 patch tile; keep it under
    `budget_bytes` so double-buffered inputs + outputs stay far below the scoped-VMEM
    limit on every generation (v7x: 64 MiB physical per core).  TS is either a multiple
    of 128 dividing the padded extent (lane-dense, unmasked stores) or the full extent
    itself (small-image case, e.g. the test shapes).
    """
    per_col = max(kp * 2, 1)
    cap = max(128, (budget_bytes // per_col) // 128 * 128)
    if s <= cap:
        return s, s                          # one full-extent tile per image
    s_pad = _round_up(s, 128)
    for cand in range(cap, 127, -128):
        if s_pad % cand == 0:
            return cand, s_pad
    return 128, s_pad


def _im2col(x_bf, kh, kw, stride, padding):
    # x_bf: (N, C, H, W) bf16 -> patches (N, C*KH*KW, OH*OW).
    # K ordered (c, kh, kw) to match PyTorch weight.reshape(C_out, C_in*KH*KW);
    # no transpose is needed for this per-image layout (cheaper than the old (K, M) one).
    n, c, h, w = x_bf.shape
    oh = (h + 2 * padding - kh) // stride + 1
    ow = (w + 2 * padding - kw) // stride + 1
    xp = jnp.pad(x_bf, ((0, 0), (0, 0), (padding, padding), (padding, padding)))
    cols = []
    for i in range(kh):
        for j in range(kw):
            cols.append(xp[:, :, i:i + stride * oh:stride, j:j + stride * ow:stride])
    p = jnp.stack(cols, axis=2)              # (N, C, KH*KW, OH, OW)
    return p.reshape(n, c * kh * kw, oh * ow), (oh, ow)


def encoder_block(x, weight, bias, gamma, beta, *,
                  kernel_size=7, padding=3, stride=4):
    del bias  # exact no-op: training-mode BN subtracts any per-channel constant
    c_out, c_in, kh, kw = weight.shape
    n = x.shape[0]

    x_bf = x.astype(jnp.bfloat16)                                   # MXU operand precision
    patches, (oh, ow) = _im2col(x_bf, kh, kw, stride, padding)      # (N, K, S) bf16
    k = c_in * kh * kw
    s = oh * ow

    kp = _round_up(k, 128)          # clean, unmasked MXU K passes
    cw = _round_up(c_out, 16)       # bf16 sublane packing for the weight LHS only
    cy = _round_up(c_out, 8)        # y / stats rows: no 16-row inflation (perf item 8)
    ts, s_pad = _spatial_tiling(s, kp)
    grid = (n, s_pad // ts)
    inv_m = 1.0 / float(n * s)      # stats over the *real* N*OH*OW (padding is zero)

    patches_p = jnp.pad(patches, ((0, 0), (0, kp - k), (0, s_pad - s)))
    w_p = jnp.pad(weight.reshape(c_out, k).astype(jnp.bfloat16),
                  ((0, cw - c_out), (0, kp - k)))
    g_p = jnp.pad(gamma.astype(jnp.float32), (0, cy - c_out))
    b_p = jnp.pad(beta.astype(jnp.float32), (0, cy - c_out))

    # -------- sweep 1: conv matmul (bf16 y out) + per-image partial BN stats ---------
    def conv_stats_kernel(p_ref, w_ref, y_ref, psum_ref, psq_ref, sum_acc, sq_acc):
        si = pl.program_id(1)

        @pl.when(si == 0)
        def _():
            sum_acc[...] = jnp.zeros_like(sum_acc)
            sq_acc[...] = jnp.zeros_like(sq_acc)

        # (Cw, Kp) @ (Kp, TS) -> (Cw, TS), f32 accumulation on the MXU.
        y = jnp.dot(w_ref[...], p_ref[...], preferred_element_type=jnp.float32)
        y = y[:cy, :]
        # Stats from the f32 accumulator, *before* the bf16 down-cast.
        sum_acc[...] += jnp.sum(y, axis=1, keepdims=True)
        sq_acc[...] += jnp.sum(y * y, axis=1, keepdims=True)
        y_ref[...] = y.astype(y_ref.dtype)

        @pl.when(si == pl.num_programs(1) - 1)
        def _():
            # Per-image partial sums -> separate output slots (megacore-safe on v7x).
            psum_ref[...] = sum_acc[...]
            psq_ref[...] = sq_acc[...]

    y_conv, psum, psq = pl.pallas_call(
        conv_stats_kernel,
        out_shape=(jax.ShapeDtypeStruct((n, cy, s_pad), jnp.bfloat16),
                   jax.ShapeDtypeStruct((n, cy, 1), jnp.float32),
                   jax.ShapeDtypeStruct((n, cy, 1), jnp.float32)),
        grid_spec=pltpu.PrefetchScalarGridSpec(
            num_scalar_prefetch=0,
            grid=grid,
            in_specs=[
                pl.BlockSpec((None, kp, ts), lambda ni, si: (ni, 0, si)),   # patches (streamed)
                pl.BlockSpec((cw, kp), lambda ni, si: (0, 0)),              # weights (resident)
            ],
            out_specs=[
                pl.BlockSpec((None, cy, ts), lambda ni, si: (ni, 0, si)),   # y (bf16)
                pl.BlockSpec((None, cy, 1), lambda ni, si: (ni, 0, 0)),     # per-image sum
                pl.BlockSpec((None, cy, 1), lambda ni, si: (ni, 0, 0)),     # per-image sum-sq
            ],
            scratch_shapes=[pltpu.VMEM((cy, 1), jnp.float32),
                            pltpu.VMEM((cy, 1), jnp.float32)],
        ),
        compiler_params=pltpu.CompilerParams(
            dimension_semantics=("parallel", "arbitrary"),
            vmem_limit_bytes=48 * 1024 * 1024),
    )(patches_p, w_p)

    # ---- tiny cross-image combine + BN fold (a few dozen scalars, plain JAX) --------
    # NOTE: single-pass E[y^2]-E[y]^2 in f32; the max(...,0) guards tiny negative var.
    tot = jnp.sum(psum, axis=0)                                   # (cy, 1)
    totsq = jnp.sum(psq, axis=0)
    mean = tot * inv_m
    var = jnp.maximum(totsq * inv_m - mean * mean, 0.0)           # biased (training) var
    scale = g_p[:, None] * lax.rsqrt(var + BN_EPS)                # (cy, 1)
    shift = b_p[:, None] - mean * scale

    # -------- sweep 2: y*scale + shift, written straight into (N, C_out, S) ----------
    # (LeakyReLU(negative_slope=1) is the identity.)
    def bn_apply_kernel(y_ref, s_ref, t_ref, o_ref):
        y = y_ref[...].astype(jnp.float32)
        o_ref[...] = (y * s_ref[...] + t_ref[...])[:c_out, :]

    out3 = pl.pallas_call(
        bn_apply_kernel,
        out_shape=jax.ShapeDtypeStruct((n, c_out, s_pad), jnp.float32),
        grid_spec=pltpu.PrefetchScalarGridSpec(
            num_scalar_prefetch=0,
            grid=grid,
            in_specs=[
                pl.BlockSpec((None, cy, ts), lambda ni, si: (ni, 0, si)),
                pl.BlockSpec((cy, 1), lambda ni, si: (0, 0)),
                pl.BlockSpec((cy, 1), lambda ni, si: (0, 0)),
            ],
            out_specs=pl.BlockSpec((None, c_out, ts), lambda ni, si: (ni, 0, si)),
        ),
        compiler_params=pltpu.CompilerParams(
            dimension_semantics=("parallel", "parallel"),
            vmem_limit_bytes=48 * 1024 * 1024),
    )(y_conv, scale, shift)

    # s_pad == s unless the large-unaligned-S fallback triggered; the reshape is a
    # minor-dim split (no transpose, no data movement).
    return out3[:, :, :s].reshape(n, c_out, oh, ow)


def _reference(x, weight, bias, gamma, beta, *, padding=3, stride=4):
    # Pure-JAX reference of the PyTorch forward (training-mode BN), with the conv fed
    # the same bf16-rounded operands as the MXU so the comparison isolates kernel error.
    y = lax.conv_general_dilated(
        x.astype(jnp.bfloat16), weight.astype(jnp.bfloat16),
        window_strides=(stride, stride),
        padding=((padding, padding), (padding, padding)),
        dimension_numbers=("NCHW", "OIHW", "NCHW"),
        preferred_element_type=jnp.float32)
    y = y + bias.reshape(1, -1, 1, 1)
    mean = jnp.mean(y, axis=(0, 2, 3), keepdims=True)
    var = jnp.mean((y - mean) ** 2, axis=(0, 2, 3), keepdims=True)
    y = (y - mean) / jnp.sqrt(var + BN_EPS)
    y = y * gamma.reshape(1, -1, 1, 1) + beta.reshape(1, -1, 1, 1)
    return jnp.where(y >= 0, y, 1.0 * y)   # LeakyReLU(negative_slope=1) == identity


if __name__ == "__main__":
    N, C_IN, C_OUT, H, W = 2, 4, 8, 16, 16
    key = jax.random.PRNGKey(0)
    kx, kw_, kb, kg, kbeta = jax.random.split(key, 5)

    x = jax.random.normal(kx, (N, C_IN, H, W), dtype=jnp.float32)
    weight = jax.random.normal(kw_, (C_OUT, C_IN, 7, 7), dtype=jnp.float32) * 0.05
    bias = jax.random.normal(kb, (C_OUT,), dtype=jnp.float32) * 0.1
    gamma = 1.0 + 0.1 * jax.random.normal(kg, (C_OUT,), dtype=jnp.float32)
    beta = 0.1 * jax.random.normal(kbeta, (C_OUT,), dtype=jnp.float32)

    out = jax.block_until_ready(jax.jit(encoder_block)(x, weight, bias, gamma, beta))
    ref = jax.block_until_ready(_reference(x, weight, bias, gamma, beta))

    # Tolerance note: the kernel stages the conv output in bf16 (perf feedback: halves
    # y traffic); on the BN-normalized output that bounds |error| by roughly
    # |y|*2^-9*gamma/sigma_y ~ 1e-2, so compare at 2e-2.
    np.testing.assert_allclose(np.asarray(out), np.asarray(ref), rtol=2e-2, atol=2e-2)

    print("KERNEL_OK")
</pallas_src>

<mosaic_0001>
module attributes {stable_mosaic.version = 11 : i64} {
  func.func @conv_stats_kernel(%arg0: i32, %arg1: i32, %arg2: memref<1x256x16xbf16, #tpu.memory_space<vmem>>, %arg3: memref<16x256xbf16, #tpu.memory_space<vmem>>, %arg4: memref<1x8x16xbf16, #tpu.memory_space<vmem>>, %arg5: memref<1x8x1xf32, #tpu.memory_space<vmem>>, %arg6: memref<1x8x1xf32, #tpu.memory_space<vmem>>, %arg7: memref<8x1xf32, #tpu.memory_space<vmem>>, %arg8: memref<8x1xf32, #tpu.memory_space<vmem>>) attributes {dimension_semantics = [#tpu.dimension_semantics<parallel>, #tpu.dimension_semantics<arbitrary>], iteration_bounds = array<i64: 2, 1>, scalar_prefetch = 0 : i64, scratch_operands = 2 : i64, tpu.core_type = #tpu.core_type<tc>, window_params = [{transform_indices = @transform_0, window_bounds = array<i64: 1, 256, 16>}, {pipeline_mode = #tpu.pipeline_mode<synchronous>, transform_indices = @transform_1, window_bounds = array<i64: 16, 256>}, {transform_indices = @transform_2, window_bounds = array<i64: 1, 8, 16>}, {transform_indices = @transform_3, window_bounds = array<i64: 1, 8, 1>}, {transform_indices = @transform_4, window_bounds = array<i64: 1, 8, 1>}]} {
    %c0_i32 = arith.constant 0 : i32
    %0 = arith.cmpi eq, %arg1, %c0_i32 : i32
    %1 = arith.extui %0 : i1 to i32
    %c0_i32_0 = arith.constant 0 : i32
    %2 = arith.cmpi ne, %1, %c0_i32_0 : i32
    scf.if %2 {
      %cst_20 = arith.constant 0.000000e+00 : f32
      %26 = vector.broadcast %cst_20 : f32 to vector<8x1xf32>
      %c0_21 = arith.constant 0 : index
      %c0_22 = arith.constant 0 : index
      %27 = vector.load %arg7[%c0_21, %c0_22] : memref<8x1xf32, #tpu.memory_space<vmem>>, vector<8x1xf32>
      tpu.vector_store %arg7[%c0_21, %c0_22], %26 {strides = array<i32>} : memref<8x1xf32, #tpu.memory_space<vmem>>, vector<8x1xf32>,
      %cst_23 = arith.constant 0.000000e+00 : f32
      %28 = vector.broadcast %cst_23 : f32 to vector<8x1xf32>
      %c0_24 = arith.constant 0 : index
      %c0_25 = arith.constant 0 : index
      %29 = vector.load %arg8[%c0_24, %c0_25] : memref<8x1xf32, #tpu.memory_space<vmem>>, vector<8x1xf32>
      tpu.vector_store %arg8[%c0_24, %c0_25], %28 {strides = array<i32>} : memref<8x1xf32, #tpu.memory_space<vmem>>, vector<8x1xf32>,
    } else {
    }
    %c0 = arith.constant 0 : index
    %c0_1 = arith.constant 0 : index
    %3 = vector.load %arg3[%c0, %c0_1] : memref<16x256xbf16, #tpu.memory_space<vmem>>, vector<16x256xbf16>
    %c0_2 = arith.constant 0 : index
    %c0_3 = arith.constant 0 : index
    %c0_4 = arith.constant 0 : index
    %4 = vector.load %arg2[%c0_2, %c0_3, %c0_4] : memref<1x256x16xbf16, #tpu.memory_space<vmem>>, vector<1x256x16xbf16>
    %5 = vector.shape_cast %4 : vector<1x256x16xbf16> to vector<256x16xbf16>
    %cst = arith.constant dense<0.000000e+00> : vector<16x16xf32>
    %6 = tpu.matmul %3, %5, %cst {dimension_numbers = #tpu.dot_dimension_numbers<[1], [0], [0], [1], [0, 0, 1, 1], [], []>} : vector<16x256xbf16>, vector<256x16xbf16>, vector<16x16xf32> -> vector<16x16xf32>
    %7 = vector.extract_strided_slice %6 {offsets = [0, 0], sizes = [8, 16], strides = [1, 1]} : vector<16x16xf32> to vector<8x16xf32>
    %c0_5 = arith.constant 0 : index
    %c0_6 = arith.constant 0 : index
    %8 = vector.load %arg7[%c0_5, %c0_6] : memref<8x1xf32, #tpu.memory_space<vmem>>, vector<8x1xf32>
    %cst_7 = arith.constant dense<0.000000e+00> : vector<8xf32>
    %9 = vector.multi_reduction <add>, %7, %cst_7 [1] : vector<8x16xf32> to vector<8xf32>
    %10 = vector.shape_cast %9 : vector<8xf32> to vector<8x1xf32>
    %11 = arith.addf %8, %10 : vector<8x1xf32>
    %c0_8 = arith.constant 0 : index
    %c0_9 = arith.constant 0 : index
    %12 = vector.load %arg7[%c0_8, %c0_9] : memref<8x1xf32, #tpu.memory_space<vmem>>, vector<8x1xf32>
    tpu.vector_store %arg7[%c0_8, %c0_9], %11 {strides = array<i32>} : memref<8x1xf32, #tpu.memory_space<vmem>>, vector<8x1xf32>,
    %c0_10 = arith.constant 0 : index
    %c0_11 = arith.constant 0 : index
    %13 = vector.load %arg8[%c0_10, %c0_11] : memref<8x1xf32, #tpu.memory_space<vmem>>, vector<8x1xf32>
    %14 = arith.mulf %7, %7 : vector<8x16xf32>
    %cst_12 = arith.constant dense<0.000000e+00> : vector<8xf32>
    %15 = vector.multi_reduction <add>, %14, %cst_12 [1] : vector<8x16xf32> to vector<8xf32>
    %16 = vector.shape_cast %15 : vector<8xf32> to vector<8x1xf32>
    %17 = arith.addf %13, %16 : vector<8x1xf32>
    %c0_13 = arith.constant 0 : index
    %c0_14 = arith.constant 0 : index
    %18 = vector.load %arg8[%c0_13, %c0_14] : memref<8x1xf32, #tpu.memory_space<vmem>>, vector<8x1xf32>
    tpu.vector_store %arg8[%c0_13, %c0_14], %17 {strides = array<i32>} : memref<8x1xf32, #tpu.memory_space<vmem>>, vector<8x1xf32>,
    %19 = arith.truncf %7 : vector<8x16xf32> to vector<8x16xbf16>
    %c0_15 = arith.constant 0 : index
    %c0_16 = arith.constant 0 : index
    %c0_17 = arith.constant 0 : index
    %20 = vector.load %arg4[%c0_15, %c0_16, %c0_17] : memref<1x8x16xbf16, #tpu.memory_space<vmem>>, vector<1x8x16xbf16>
    %21 = vector.shape_cast %20 : vector<1x8x16xbf16> to vector<8x16xbf16>
    %22 = vector.shape_cast %19 : vector<8x16xbf16> to vector<1x8x16xbf16>
    tpu.vector_store %arg4[%c0_15, %c0_16, %c0_17], %22 {strides = array<i32>} : memref<1x8x16xbf16, #tpu.memory_space<vmem>>, vector<1x8x16xbf16>,
    %c0_i32_18 = arith.constant 0 : i32
    %23 = arith.cmpi eq, %arg1, %c0_i32_18 : i32
    %24 = arith.extui %23 : i1 to i32
    %c0_i32_19 = arith.constant 0 : i32
    %25 = arith.cmpi ne, %24, %c0_i32_19 : i32
    scf.if %25 {
      %c0_20 = arith.constant 0 : index
      %c0_21 = arith.constant 0 : index
      %26 = vector.load %arg7[%c0_20, %c0_21] : memref<8x1xf32, #tpu.memory_space<vmem>>, vector<8x1xf32>
      %c0_22 = arith.constant 0 : index
      %c0_23 = arith.constant 0 : index
      %c0_24 = arith.constant 0 : index
      %27 = vector.load %arg5[%c0_22, %c0_23, %c0_24] : memref<1x8x1xf32, #tpu.memory_space<vmem>>, vector<1x8x1xf32>
      %28 = vector.shape_cast %27 : vector<1x8x1xf32> to vector<8x1xf32>
      %29 = vector.shape_cast %26 : vector<8x1xf32> to vector<1x8x1xf32>
      tpu.vector_store %arg5[%c0_22, %c0_23, %c0_24], %29 {strides = array<i32>} : memref<1x8x1xf32, #tpu.memory_space<vmem>>, vector<1x8x1xf32>,
      %c0_25 = arith.constant 0 : index
      %c0_26 = arith.constant 0 : index
      %30 = vector.load %arg8[%c0_25, %c0_26] : memref<8x1xf32, #tpu.memory_space<vmem>>, vector<8x1xf32>
      %c0_27 = arith.constant 0 : index
      %c0_28 = arith.constant 0 : index
      %c0_29 = arith.constant 0 : index
      %31 = vector.load %arg6[%c0_27, %c0_28, %c0_29] : memref<1x8x1xf32, #tpu.memory_space<vmem>>, vector<1x8x1xf32>
      %32 = vector.shape_cast %31 : vector<1x8x1xf32> to vector<8x1xf32>
      %33 = vector.shape_cast %30 : vector<8x1xf32> to vector<1x8x1xf32>
      tpu.vector_store %arg6[%c0_27, %c0_28, %c0_29], %33 {strides = array<i32>} : memref<1x8x1xf32, #tpu.memory_space<vmem>>, vector<1x8x1xf32>,
    } else {
    }
    return
  }
  func.func @transform_0(%arg0: i32, %arg1: i32) -> (i32, i32, i32) {
    %c0_i32 = arith.constant 0 : i32
    %c0_i32_0 = arith.constant 0 : i32
    return %arg0, %c0_i32, %arg1 : i32, i32, i32
  }
  func.func @transform_1(%arg0: i32, %arg1: i32) -> (i32, i32) {
    %c0_i32 = arith.constant 0 : i32
    %c0_i32_0 = arith.constant 0 : i32
    %c0_i32_1 = arith.constant 0 : i32
    return %c0_i32, %c0_i32_0 : i32, i32
  }
  func.func @transform_2(%arg0: i32, %arg1: i32) -> (i32, i32, i32) {
    %c0_i32 = arith.constant 0 : i32
    %c0_i32_0 = arith.constant 0 : i32
    return %arg0, %c0_i32, %arg1 : i32, i32, i32
  }
  func.func @transform_3(%arg0: i32, %arg1: i32) -> (i32, i32, i32) {
    %c0_i32 = arith.constant 0 : i32
    %c0_i32_0 = arith.constant 0 : i32
    %c0_i32_1 = arith.constant 0 : i32
    return %arg0, %c0_i32, %c0_i32_0 : i32, i32, i32
  }
  func.func @transform_4(%arg0: i32, %arg1: i32) -> (i32, i32, i32) {
    %c0_i32 = arith.constant 0 : i32
    %c0_i32_0 = arith.constant 0 : i32
    %c0_i32_1 = arith.constant 0 : i32
    return %arg0, %c0_i32, %c0_i32_0 : i32, i32, i32
  }
}

module attributes {stable_mosaic.version = 11 : i64} {
  func.func @bn_apply_kernel(%arg0: i32, %arg1: i32, %arg2: memref<1x8x16xbf16, #tpu.memory_space<vmem>>, %arg3: memref<8x1xf32, #tpu.memory_space<vmem>>, %arg4: memref<8x1xf32, #tpu.memory_space<vmem>>, %arg5: memref<1x8x16xf32, #tpu.memory_space<vmem>>) attributes {dimension_semantics = [#tpu.dimension_semantics<parallel>, #tpu.dimension_semantics<parallel>], iteration_bounds = array<i64: 2, 1>, scalar_prefetch = 0 : i64, scratch_operands = 0 : i64, tpu.core_type = #tpu.core_type<tc>, window_params = [{transform_indices = @transform_0, window_bounds = array<i64: 1, 8, 16>}, {pipeline_mode = #tpu.pipeline_mode<synchronous>, transform_indices = @transform_1, window_bounds = array<i64: 8, 1>}, {pipeline_mode = #tpu.pipeline_mode<synchronous>, transform_indices = @transform_2, window_bounds = array<i64: 8, 1>}, {transform_indices = @transform_3, window_bounds = array<i64: 1, 8, 16>}]} {
    %c0 = arith.constant 0 : index
    %c0_0 = arith.constant 0 : index
    %c0_1 = arith.constant 0 : index
    %0 = vector.load %arg2[%c0, %c0_0, %c0_1] : memref<1x8x16xbf16, #tpu.memory_space<vmem>>, vector<1x8x16xbf16>
    %1 = vector.shape_cast %0 : vector<1x8x16xbf16> to vector<8x16xbf16>
    %2 = arith.extf %1 : vector<8x16xbf16> to vector<8x16xf32>
    %c0_2 = arith.constant 0 : index
    %c0_3 = arith.constant 0 : index
    %3 = vector.load %arg3[%c0_2, %c0_3] : memref<8x1xf32, #tpu.memory_space<vmem>>, vector<8x1xf32>
    %4 = vector.broadcast %3 : vector<8x1xf32> to vector<8x16xf32>
    %5 = arith.mulf %2, %4 : vector<8x16xf32>
    %c0_4 = arith.constant 0 : index
    %c0_5 = arith.constant 0 : index
    %6 = vector.load %arg4[%c0_4, %c0_5] : memref<8x1xf32, #tpu.memory_space<vmem>>, vector<8x1xf32>
    %7 = vector.broadcast %6 : vector<8x1xf32> to vector<8x16xf32>
    %8 = arith.addf %5, %7 : vector<8x16xf32>
    %c0_6 = arith.constant 0 : index
    %c0_7 = arith.constant 0 : index
    %c0_8 = arith.constant 0 : index
    %9 = vector.load %arg5[%c0_6, %c0_7, %c0_8] : memref<1x8x16xf32, #tpu.memory_space<vmem>>, vector<1x8x16xf32>
    %10 = vector.shape_cast %9 : vector<1x8x16xf32> to vector<8x16xf32>
    %11 = vector.shape_cast %8 : vector<8x16xf32> to vector<1x8x16xf32>
    tpu.vector_store %arg5[%c0_6, %c0_7, %c0_8], %11 {strides = array<i32>} : memref<1x8x16xf32, #tpu.memory_space<vmem>>, vector<1x8x16xf32>,
    return
  }
  func.func @transform_0(%arg0: i32, %arg1: i32) -> (i32, i32, i32) {
    %c0_i32 = arith.constant 0 : i32
    %c0_i32_0 = arith.constant 0 : i32
    return %arg0, %c0_i32, %arg1 : i32, i32, i32
  }
  func.func @transform_1(%arg0: i32, %arg1: i32) -> (i32, i32) {
    %c0_i32 = arith.constant 0 : i32
    %c0_i32_0 = arith.constant 0 : i32
    %c0_i32_1 = arith.constant 0 : i32
    return %c0_i32, %c0_i32_0 : i32, i32
  }
  func.func @transform_2(%arg0: i32, %arg1: i32) -> (i32, i32) {
    %c0_i32 = arith.constant 0 : i32
    %c0_i32_0 = arith.constant 0 : i32
    %c0_i32_1 = arith.constant 0 : i32
    return %c0_i32, %c0_i32_0 : i32, i32
  }
  func.func @transform_3(%arg0: i32, %arg1: i32) -> (i32, i32, i32) {
    %c0_i32 = arith.constant 0 : i32
    %c0_i32_0 = arith.constant 0 : i32
    return %arg0, %c0_i32, %arg1 : i32, i32, i32
  }
}

</mosaic_0001>

<bundles_post_ra>
// kernel: encoder_block.2
= control target key start
LH: loop header
LB: loop body
LE: loop exit
PB: predicated region body
PF: predicated region fallthrough
CT: control target
= control target key end

     0   :  { %s747_s15 = smov 0   ;;  %s749_s16 = smov 0   ;;  %s803_s0 = inlined_call_operand.vmem [shape: bf16[2,256,16], index: 0, kind: input, shape index: {}]   ;;  %s804_s1 = inlined_call_operand.vmem [shape: bf16[16,256], index: 1, kind: input, shape index: {}]   ;;  %s805_s2 = inlined_call_operand.vmem [shape: bf16[2,8,16], index: 2, kind: output, shape index: {0}]   ;;  %s806_s3 = inlined_call_operand.vmem [shape: f32[2,8,1], index: 3, kind: output, shape index: {1}]   ;;  %s807_s4 = inlined_call_operand.vmem [shape: f32[2,8,1], index: 4, kind: output, shape index: {2}]  }
   0x1   :  { %s751_s17 = smov 0  }
   0x2 LB: > { %s27_s18 = sadd.s32 1, %s715_s16  ;;  %p604_p0 = scmp.ge.s32.totalorder %s719_s17, 1  ;;  %s719_s17 = sphi %s751_s17, %s15_s17   ;;  %s715_s16 = sphi %s749_s16, %s809_s16   ;;  %s711_s15 = sphi %s747_s15, %s808_s15  }
   0x3   : > { %p29_p1 = scmp.ge.s32.totalorder %s27_s18, 2  ;;  %p186_p2 = scmp.lt.s32.totalorder %s719_s17, 3 }
   0x5   : > { %s811_s18 = smov (%p29_p1, %s27_s18), 0  ;;  %p187_p3 = pnand %p604_p0, %p186_p2 }
   0x6   : > { %p225_p4 = scmp.lt.s32.totalorder (!%p187_p3), %s711_s15, 1  ;;  %v696_v0 = vld [vmem:[%s804_s1 + $0x4] ss:$8 sps:$4 sm:$0xff] (!%p187_p3)   ;;  %v694_v17 = vld [vmem:[%s804_s1] ss:$8 sps:$4 sm:$0xff] (!%p187_p3)   ;;  %vm253_vm0 = vcmask (!%p187_p3), 7168  }
   0x7   : > { %190 = sbr.rel (%p187_p3) target bundleno = 423 (0x1a7), region = 28  ;;  %428 = vmatprep.mubr.bf16.mxu0 (!%p187_p3), %v696_v0  ;;  %v721_v18 = vmov (!%p187_p3), 0.0   ;;  %vm437_vm1 = vcmask (!%p187_p3), 130048   ;;  %vm452_vm2 = vcmask (!%p187_p3), 125952  }
   0x8   : > { %254 = vst.msk [vmem:[#allocation2] sm:$0xff] (!%p187_p3), %vm253_vm0, %v721_v18  ;;  %255 = vst.msk [vmem:[#allocation3] sm:$0xff] (!%p187_p3), %vm253_vm0, %v721_v18 }
   0xe   : > { %s813_s15 = smov (!%p225_p4, %s711_s15), 1 }
   0xf   : > { %s630_s21 = sshll.u32 %s813_s15, 7  ;;  %s607_s27 = sshll.u32 %s813_s15, 2  ;;  %v436_v28 = vld [vmem:[#allocation2] sm:$0xff]  ;;  %v444_v31 = vld [vmem:[#allocation3] sm:$0xff] }
  0x10   : > { %s232_s24 = scalar_lea.vmem %s803_s0, %s630_s21  ;;  %s239_s30 = scalar_lea.vmem %s805_s2, %s607_s27 }
  0x11   : > { %v678_v1 = vld [vmem:[%s232_s24 + $0x40] sm:$0xff]   ;;  %v680_v3 = vld [vmem:[%s232_s24 + $0x48] sm:$0xff]   ;;  %v682_v5 = vld [vmem:[%s232_s24 + $0x50] sm:$0xff]   ;;  %s608_s5 = sshll.u32 %s813_s15, 3 }
  0x12   : > { %v679_v2 = vld [vmem:[%s232_s24] sm:$0xff]   ;;  %631 = vmatprep.subr.bf16.mxu0 %v678_v1  ;;  %v681_v4 = vld [vmem:[%s232_s24 + $0x8] sm:$0xff]   ;;  %v683_v6 = vld [vmem:[%s232_s24 + $0x10] sm:$0xff]   ;;  %s243_s8 = scalar_lea.vmem %s806_s3, %s608_s5  ;;  %s247_s11 = scalar_lea.vmem %s807_s4, %s608_s5 }
  0x13   : > { %632 = vmatpush3.bf16.msra.mxu0 %v679_v2  ;;  %v684_v7 = vld [vmem:[%s232_s24 + $0x58] sm:$0xff]   ;;  %v686_v9 = vld [vmem:[%s232_s24 + $0x60] sm:$0xff]   ;;  %v688_v11 = vld [vmem:[%s232_s24 + $0x68] sm:$0xff]  }
  0x14   : > { %633 = vmatprep.subr.bf16.mxu0 %v680_v3  ;;  %v685_v8 = vld [vmem:[%s232_s24 + $0x18] sm:$0xff]   ;;  %v687_v10 = vld [vmem:[%s232_s24 + $0x20] sm:$0xff]   ;;  %v689_v12 = vld [vmem:[%s232_s24 + $0x28] sm:$0xff]  }
  0x15   : > { %v690_v13 = vld [vmem:[%s232_s24 + $0x70] sm:$0xff]   ;;  %v692_v15 = vld [vmem:[%s232_s24 + $0x78] sm:$0xff]  }
  0x16   : > { %v691_v14 = vld [vmem:[%s232_s24 + $0x30] sm:$0xff]   ;;  %v693_v16 = vld [vmem:[%s232_s24 + $0x38] sm:$0xff]  }
  0x17   : > { %634 = vmatpush3.bf16.msra.mxu0 %v681_v4 }
  0x18   : > { %635 = vmatprep.subr.bf16.mxu0 %v682_v5 }
  0x1b   : > { %636 = vmatpush3.bf16.msra.mxu0 %v683_v6 }
  0x1c   : > { %637 = vmatprep.subr.bf16.mxu0 %v684_v7 }
  0x1f   : > { %638 = vmatpush3.bf16.msra.mxu0 %v685_v8 }
  0x20   : > { %639 = vmatprep.subr.bf16.mxu0 %v686_v9 }
  0x23   : > { %640 = vmatpush3.bf16.msra.mxu0 %v687_v10 }
  0x24   : > { %641 = vmatprep.subr.bf16.mxu0 %v688_v11 }
  0x27   : > { %642 = vmatpush3.bf16.msra.mxu0 %v689_v12 }
  0x28   : > { %643 = vmatprep.subr.bf16.mxu0 %v690_v13 }
  0x2b   : > { %644 = vmatpush3.bf16.msra.mxu0 %v691_v14 }
  0x2c   : > { %645 = vmatprep.subr.bf16.mxu0 %v692_v15 }
  0x2f   : > { %646 = vmatpush3.bf16.msra.mxu0 %v693_v16 }
  0x32   : > { %429 = vmatmul.mubr.bf16.vlgmr.msra.gmra.mrb[0].mxu0 %v694_v17 }
 0x105   : > { %v647_v19 = vpop.f32.mrb[0].mxu0 }
 0x106   : > { %v648_v20 = vpop.f32.mrb[1].mxu0 }
 0x107   : > { %v649_v21 = vadd.f32 %v648_v20, %v647_v19  ;;  %v650_v22 = vpop.f32.mrb[2].mxu0 }
 0x108   : > { %v651_v23 = vpop.f32.mrb[3].mxu0 }
 0x109   : > { %v451_v24 = vpack.c.bf16 %v649_v21, %v649_v21  ;;  %v438_v25 = vsel %vm437_vm1, %v649_v21, 0.0  ;;  %v445_v26 = vmul.f32 %v649_v21, %v649_v21 }
 0x10a   : > { %439 = vadd.xlane.f32.xlu0 %v438_v25 }
 0x10b   : > { %453 = vst.msk [vmem:[%s239_s30] sm:$0xf] %vm452_vm2, %v451_v24  ;;  %v446_v27 = vsel %vm437_vm1, %v445_v26, 0.0 }
 0x10e   : > { %447 = vadd.xlane.f32.xlu0 %v446_v27 }
 0x197   : > { %v440_v29 = vpop.xlane.xlu0 %439 }
 0x198   : > { %v441_v30 = vadd.f32 %v440_v29, %v436_v28 }
 0x19a   : > { %443 = vst.msk [vmem:[#allocation2] sm:$0xff] %vm253_vm0, %v441_v30 }
 0x19b   : > { %v448_v32 = vpop.xlane.xlu0 %447 }
 0x19c   : > { %v449_v33 = vadd.f32 %v448_v32, %v444_v31 }
 0x19e   : > { %450 = vst.msk [vmem:[#allocation3] sm:$0xff] %vm253_vm0, %v449_v33 }
 0x1a1   : > { %v457_v34 = vld [vmem:[#allocation2] sm:$0xff] }
 0x1a2   : > { %458 = vst.msk [vmem:[%s243_s8] sm:$0xff] %vm253_vm0, %v457_v34 }
 0x1a5   : > { %v459_v35 = vld [vmem:[#allocation3] sm:$0xff] }
 0x1a6   : > { %460 = vst.msk [vmem:[%s247_s11] sm:$0xff] %vm253_vm0, %v459_v35 }
 0x1a7 PF: > { %s15_s17 = sadd.s32 1, %s719_s17   ;;  %s808_s15 = smov %s715_s16 }
 0x1a8   : > { %p12_p5 = scmp.ge.s32.totalorder %s15_s17, 4   ;;  %s809_s16 = smov %s811_s18 }
 0x1aa   :  { %14 = sbr.rel (!%p12_p5) target bundleno = 2 (0x2), region = 90 }

// kernel: encoder_block.3
= control target key start
LH: loop header
LB: loop body
LE: loop exit
PB: predicated region body
PF: predicated region fallthrough
CT: control target
= control target key end

     0   :  { %s369_s12 = smov 0   ;;  %s371_s13 = smov 0   ;;  %s405_s0 = inlined_call_operand.vmem [shape: bf16[2,8,16], index: 0, kind: input, shape index: {}]   ;;  %s406_s1 = inlined_call_operand.vmem [shape: f32[8,1], index: 1, kind: input, shape index: {}]   ;;  %s407_s2 = inlined_call_operand.vmem [shape: f32[8,1], index: 2, kind: input, shape index: {}]   ;;  %s408_s3 = inlined_call_operand.vmem [shape: f32[2,8,16], index: 3, kind: output, shape index: {}]  }
   0x1   :  { %s373_s14 = smov 0  }
   0x2 LB: > { %s25_s15 = sadd.s32 1, %s342_s13  ;;  %p293_p0 = scmp.ge.s32.totalorder %s346_s14, 1  ;;  %s346_s14 = sphi %s373_s14, %s13_s14   ;;  %s342_s13 = sphi %s371_s13, %s410_s13   ;;  %s338_s12 = sphi %s369_s12, %s409_s12  }
   0x3   : > { %p27_p1 = scmp.ge.s32.totalorder %s25_s15, 2  ;;  %p155_p2 = scmp.lt.s32.totalorder %s346_s14, 3 }
   0x5   : > { %s412_s15 = smov (%p27_p1, %s25_s15), 0  ;;  %p156_p3 = pnand %p293_p0, %p155_p2 }
   0x6   : > { %v199_v0 = vld [vmem:[%s406_s1] sm:$0xff] (!%p156_p3)  ;;  %v348_v1 = vmov (!%p156_p3), 0   ;;  %p183_p4 = scmp.lt.s32.totalorder (!%p156_p3), %s338_s12, 1  ;;  %vm213_vm0 = vcmask (!%p156_p3), 130048  }
   0x7   : > { %159 = sbr.rel (%p156_p3) target bundleno = 143 (0x8f), region = 32  ;;  %323 = vset.pattern.permute.xlu0 (!%p156_p3), %v348_v1  ;;  %v206_v2 = vld [vmem:[%s407_s2] sm:$0xff] (!%p156_p3) }
   0x8   : > { %202 = vperm.xlu0 (!%p156_p3), %323, %v199_v0  }
   0xc   : > { %209 = vperm.xlu0 (!%p156_p3), %323, %v206_v2  }
   0xe   : > { %s414_s12 = smov (!%p183_p4, %s338_s12), 1 }
   0xf   : > { %s294_s20 = sshll.u32 %s414_s12, 2  ;;  %s295_s24 = sshll.u32 %s414_s12, 3 }
  0x10   : > { %s189_s23 = scalar_lea.vmem %s405_s0, %s294_s20  ;;  %s196_s27 = scalar_lea.vmem %s408_s3, %s295_s24 }
  0x11   : > { %v197_v3 = vld [vmem:[%s189_s23] sm:$0xf] }
  0x12   : > { %v198_v4 = vunpack.c.l.bf16 %v197_v3 }
  0x87   : > { %v203_v5 = vpop.permute.xlu0 %202 }
  0x88   : > { %v205_v6 = vmul.f32 %v203_v5, %v198_v4 }
  0x8b   : > { %v210_v7 = vpop.permute.xlu0 %209 }
  0x8c   : > { %v212_v8 = vadd.f32 %v210_v7, %v205_v6 }
  0x8e   : > { %214 = vst.msk [vmem:[%s196_s27] sm:$0xff] %vm213_vm0, %v212_v8 }
  0x8f PF: > { %s13_s14 = sadd.s32 1, %s346_s14   ;;  %s409_s12 = smov %s342_s13 }
  0x90   : > { %p10_p5 = scmp.ge.s32.totalorder %s13_s14, 4   ;;  %s410_s13 = smov %s412_s15 }
  0x92   :  { %12 = sbr.rel (!%p10_p5) target bundleno = 2 (0x2), region = 62 }

</bundles_post_ra>
